<compile_context>
chip_gen: v6e
topology: v6e:2x2x1
jax: 0.10.0
libtpu: 0.0.40
codegen_flags: <defaults>
</compile_context>

<pallas_src>
import functools

import jax
import jax.numpy as jnp
import numpy as np
from jax.experimental import pallas as pl
from jax.experimental.pallas import tpu as pltpu


def _round_up(x, m):
    return ((x + m - 1) // m) * m


def sac_actor_kernel(x_ref, w1_ref, b1_ref, w2_ref, b2_ref, w3_ref, b3_ref,
                     out_ref, *, compute_dtype):
    """Fused MLP + softmax on one (TB, state_dim) batch tile."""
    cd = compute_dtype
    # In-kernel cast of the f32 state to the MXU operand dtype (VPU has slack;
    # avoids a separate XLA cast pass over the whole batch in HBM).
    x = x_ref[...].astype(cd)

    # Layer 1: Linear + ReLU (MXU matmul, f32 accumulation).
    h1 = jnp.dot(x, w1_ref[...], preferred_element_type=jnp.float32)
    h1 = jnp.maximum(h1 + b1_ref[...], 0.0).astype(cd)

    # Layer 2: Linear + ReLU.
    h2 = jnp.dot(h1, w2_ref[...], preferred_element_type=jnp.float32)
    h2 = jnp.maximum(h2 + b2_ref[...], 0.0).astype(cd)

    # Layer 3: Linear to the (unpadded) action logits.
    logits = jnp.dot(h2, w3_ref[...], preferred_element_type=jnp.float32)
    logits = logits + b3_ref[...]

    # Numerically stable softmax over the true action_dim lanes; exact
    # division so probability rows sum to 1 to f32 precision (downstream SAC
    # takes log-probs / entropy from these).
    m = jnp.max(logits, axis=-1, keepdims=True)
    e = jnp.exp(logits - m)
    denom = jnp.sum(e, axis=-1, keepdims=True)
    out_ref[...] = (e / denom).astype(out_ref.dtype)


def sac_actor_forward(state, params, *, block_b=2048,
                      compute_dtype=jnp.bfloat16):
    """Pallas-kernel implementation of SACActor.forward(state)."""
    w1, b1, w2, b2, w3, b3 = params
    B, state_dim = state.shape
    h1_dim = w1.shape[1]
    h2_dim = w2.shape[1]
    action_dim = w3.shape[1]

    # Batch tile: multiple of 8 sublanes, capped at block_b (2048 default).
    TB = min(block_b, _round_up(B, 8))
    # v7x: ensure at least 2 grid steps when the batch allows, so the
    # "parallel" axis can shard steps across both TensorCores.
    if B > 8 and pl.cdiv(B, TB) < 2:
        TB = max(8, _round_up(pl.cdiv(B, 2), 8))

    grid = (pl.cdiv(B, TB),)   # ragged last block handled by Pallas

    # bf16 MXU operands; biases stay f32 (added onto the f32 accumulators).
    w1c = w1.astype(compute_dtype)
    w2c = w2.astype(compute_dtype)
    w3c = w3.astype(compute_dtype)
    b1f = b1.astype(jnp.float32)
    b2f = b2.astype(jnp.float32)
    b3f = b3.astype(jnp.float32)

    def const(a):
        # Full-array block, constant index map -> DMA'd once, VMEM-resident
        # across all grid steps.
        return pl.BlockSpec(a.shape, lambda i: (0, 0))

    flops = 2 * B * (state_dim * h1_dim + h1_dim * h2_dim
                     + h2_dim * action_dim)
    bytes_accessed = (B * state_dim * state.dtype.itemsize
                      + (w1c.size + w2c.size + w3c.size) * 2
                      + (b1f.size + b2f.size + b3f.size) * 4
                      + B * action_dim * 4)
    cost = pl.CostEstimate(flops=flops,
                           transcendentals=B * action_dim,
                           bytes_accessed=bytes_accessed)

    out = pl.pallas_call(
        functools.partial(sac_actor_kernel, compute_dtype=compute_dtype),
        out_shape=jax.ShapeDtypeStruct((B, action_dim), jnp.float32),
        grid=grid,
        in_specs=[pl.BlockSpec((TB, state_dim), lambda i: (i, 0)),
                  const(w1c), const(b1f),
                  const(w2c), const(b2f),
                  const(w3c), const(b3f)],
        out_specs=pl.BlockSpec((TB, action_dim), lambda i: (i, 0)),
        compiler_params=pltpu.CompilerParams(
            dimension_semantics=("parallel",)),
        cost_estimate=cost,
    )(state, w1c, b1f, w2c, b2f, w3c, b3f)

    return out


def init_params(key, state_dim, action_dim, hidden_layers=(128, 64)):
    """Deterministic init mimicking torch.nn.Linear: U(-1/sqrt(fan_in), +)."""
    dims = [state_dim, hidden_layers[0], hidden_layers[1], action_dim]
    params = []
    for i in range(3):
        fan_in, fan_out = dims[i], dims[i + 1]
        key, kw, kb = jax.random.split(key, 3)
        bound = 1.0 / np.sqrt(fan_in)
        w = jax.random.uniform(kw, (fan_in, fan_out), jnp.float32,
                               minval=-bound, maxval=bound)
        b = jax.random.uniform(kb, (1, fan_out), jnp.float32,
                               minval=-bound, maxval=bound)
        params += [w, b]
    return tuple(params)


def reference_forward(state, params, compute_dtype=jnp.bfloat16):
    """Pure-JAX reference with the same bf16-operand / f32-accum recipe."""
    w1, b1, w2, b2, w3, b3 = params
    cd = compute_dtype
    h1 = jnp.maximum(
        jnp.dot(state.astype(cd), w1.astype(cd),
                preferred_element_type=jnp.float32) + b1, 0.0)
    h2 = jnp.maximum(
        jnp.dot(h1.astype(cd), w2.astype(cd),
                preferred_element_type=jnp.float32) + b2, 0.0)
    logits = jnp.dot(h2.astype(cd), w3.astype(cd),
                     preferred_element_type=jnp.float32) + b3
    return jax.nn.softmax(logits, axis=-1)


if __name__ == "__main__":
    state_dim = 16
    action_dim = 8
    batch = 2

    key = jax.random.PRNGKey(0)
    key, pk, sk = jax.random.split(key, 3)

    params = init_params(pk, state_dim, action_dim, hidden_layers=(128, 64))
    state = jax.random.normal(sk, (batch, state_dim), dtype=jnp.float32)

    # Small-batch path (single ragged block).
    probs = jax.block_until_ready(sac_actor_forward(state, params))
    ref = reference_forward(state, params)
    np.testing.assert_allclose(np.asarray(probs), np.asarray(ref),
                               rtol=5e-3, atol=5e-3)
    np.testing.assert_allclose(np.asarray(probs).sum(-1), np.ones(batch),
                               rtol=1e-4, atol=1e-4)

    # Batch that fits one default tile -> exercises the 2-step split (v7x path).
    key, sk2 = jax.random.split(key)
    state_mid = jax.random.normal(sk2, (300, state_dim), dtype=jnp.float32)
    probs_mid = jax.block_until_ready(sac_actor_forward(state_mid, params))
    ref_mid = reference_forward(state_mid, params)
    np.testing.assert_allclose(np.asarray(probs_mid), np.asarray(ref_mid),
                               rtol=5e-3, atol=5e-3)

    # Multi-step grid with a ragged last block (300 = 128 + 128 + 44).
    probs_rag = jax.block_until_ready(
        sac_actor_forward(state_mid, params, block_b=128))
    np.testing.assert_allclose(np.asarray(probs_rag), np.asarray(ref_mid),
                               rtol=5e-3, atol=5e-3)
    np.testing.assert_allclose(np.asarray(probs_rag).sum(-1), np.ones(300),
                               rtol=1e-4, atol=1e-4)

    print("KERNEL_OK")
</pallas_src>

<mosaic_0001>
module attributes {stable_mosaic.version = 11 : i64} {
  func.func @sac_actor_kernel(%arg0: i32, %arg1: memref<8x16xf32, #tpu.memory_space<vmem>>, %arg2: memref<16x128xbf16, #tpu.memory_space<vmem>>, %arg3: memref<1x128xf32, #tpu.memory_space<vmem>>, %arg4: memref<128x64xbf16, #tpu.memory_space<vmem>>, %arg5: memref<1x64xf32, #tpu.memory_space<vmem>>, %arg6: memref<64x8xbf16, #tpu.memory_space<vmem>>, %arg7: memref<1x8xf32, #tpu.memory_space<vmem>>, %arg8: memref<8x8xf32, #tpu.memory_space<vmem>>) attributes {dimension_semantics = [#tpu.dimension_semantics<parallel>], iteration_bounds = array<i64: 1>, scalar_prefetch = 0 : i64, scratch_operands = 0 : i64, tpu.core_type = #tpu.core_type<tc>, window_params = [{transform_indices = @transform_0, window_bounds = array<i64: 8, 16>}, {pipeline_mode = #tpu.pipeline_mode<synchronous>, transform_indices = @transform_1, window_bounds = array<i64: 16, 128>}, {pipeline_mode = #tpu.pipeline_mode<synchronous>, transform_indices = @transform_2, window_bounds = array<i64: 1, 128>}, {pipeline_mode = #tpu.pipeline_mode<synchronous>, transform_indices = @transform_3, window_bounds = array<i64: 128, 64>}, {pipeline_mode = #tpu.pipeline_mode<synchronous>, transform_indices = @transform_4, window_bounds = array<i64: 1, 64>}, {pipeline_mode = #tpu.pipeline_mode<synchronous>, transform_indices = @transform_5, window_bounds = array<i64: 64, 8>}, {pipeline_mode = #tpu.pipeline_mode<synchronous>, transform_indices = @transform_6, window_bounds = array<i64: 1, 8>}, {transform_indices = @transform_7, window_bounds = array<i64: 8, 8>}]} {
    %c0 = arith.constant 0 : index
    %c0_0 = arith.constant 0 : index
    %0 = vector.load %arg1[%c0, %c0_0] : memref<8x16xf32, #tpu.memory_space<vmem>>, vector<8x16xf32>
    %1 = arith.truncf %0 : vector<8x16xf32> to vector<8x16xbf16>
    %c0_1 = arith.constant 0 : index
    %c0_2 = arith.constant 0 : index
    %2 = vector.load %arg2[%c0_1, %c0_2] : memref<16x128xbf16, #tpu.memory_space<vmem>>, vector<16x128xbf16>
    %cst = arith.constant dense<0.000000e+00> : vector<8x128xf32>
    %3 = tpu.matmul %1, %2, %cst {dimension_numbers = #tpu.dot_dimension_numbers<[1], [0], [0], [1], [0, 0, 1, 1], [], []>} : vector<8x16xbf16>, vector<16x128xbf16>, vector<8x128xf32> -> vector<8x128xf32>
    %c0_3 = arith.constant 0 : index
    %c0_4 = arith.constant 0 : index
    %4 = vector.load %arg3[%c0_3, %c0_4] : memref<1x128xf32, #tpu.memory_space<vmem>>, vector<1x128xf32>
    %5 = vector.broadcast %4 : vector<1x128xf32> to vector<8x128xf32>
    %6 = arith.addf %3, %5 : vector<8x128xf32>
    %cst_5 = arith.constant 0.000000e+00 : f32
    %7 = vector.broadcast %cst_5 : f32 to vector<8x128xf32>
    %8 = arith.maximumf %6, %7 : vector<8x128xf32>
    %9 = arith.truncf %8 : vector<8x128xf32> to vector<8x128xbf16>
    %c0_6 = arith.constant 0 : index
    %c0_7 = arith.constant 0 : index
    %10 = vector.load %arg4[%c0_6, %c0_7] : memref<128x64xbf16, #tpu.memory_space<vmem>>, vector<128x64xbf16>
    %cst_8 = arith.constant dense<0.000000e+00> : vector<8x64xf32>
    %11 = tpu.matmul %9, %10, %cst_8 {dimension_numbers = #tpu.dot_dimension_numbers<[1], [0], [0], [1], [0, 0, 1, 1], [], []>} : vector<8x128xbf16>, vector<128x64xbf16>, vector<8x64xf32> -> vector<8x64xf32>
    %c0_9 = arith.constant 0 : index
    %c0_10 = arith.constant 0 : index
    %12 = vector.load %arg5[%c0_9, %c0_10] : memref<1x64xf32, #tpu.memory_space<vmem>>, vector<1x64xf32>
    %13 = vector.broadcast %12 : vector<1x64xf32> to vector<8x64xf32>
    %14 = arith.addf %11, %13 : vector<8x64xf32>
    %cst_11 = arith.constant 0.000000e+00 : f32
    %15 = vector.broadcast %cst_11 : f32 to vector<8x64xf32>
    %16 = arith.maximumf %14, %15 : vector<8x64xf32>
    %17 = arith.truncf %16 : vector<8x64xf32> to vector<8x64xbf16>
    %c0_12 = arith.constant 0 : index
    %c0_13 = arith.constant 0 : index
    %18 = vector.load %arg6[%c0_12, %c0_13] : memref<64x8xbf16, #tpu.memory_space<vmem>>, vector<64x8xbf16>
    %cst_14 = arith.constant dense<0.000000e+00> : vector<8x8xf32>
    %19 = tpu.matmul %17, %18, %cst_14 {dimension_numbers = #tpu.dot_dimension_numbers<[1], [0], [0], [1], [0, 0, 1, 1], [], []>} : vector<8x64xbf16>, vector<64x8xbf16>, vector<8x8xf32> -> vector<8x8xf32>
    %c0_15 = arith.constant 0 : index
    %c0_16 = arith.constant 0 : index
    %20 = vector.load %arg7[%c0_15, %c0_16] : memref<1x8xf32, #tpu.memory_space<vmem>>, vector<1x8xf32>
    %21 = vector.broadcast %20 : vector<1x8xf32> to vector<8x8xf32>
    %22 = arith.addf %19, %21 : vector<8x8xf32>
    %cst_17 = arith.constant dense<0xFF800000> : vector<8xf32>
    %23 = vector.multi_reduction <maximumf>, %22, %cst_17 [1] : vector<8x8xf32> to vector<8xf32>
    %24 = vector.shape_cast %23 : vector<8xf32> to vector<8x1xf32>
    %25 = vector.broadcast %24 : vector<8x1xf32> to vector<8x8xf32>
    %26 = arith.subf %22, %25 : vector<8x8xf32>
    %27 = math.exp %26 : vector<8x8xf32>
    %cst_18 = arith.constant dense<0.000000e+00> : vector<8xf32>
    %28 = vector.multi_reduction <add>, %27, %cst_18 [1] : vector<8x8xf32> to vector<8xf32>
    %29 = vector.shape_cast %28 : vector<8xf32> to vector<8x1xf32>
    %30 = vector.broadcast %29 : vector<8x1xf32> to vector<8x8xf32>
    %31 = arith.divf %27, %30 : vector<8x8xf32>
    %c0_19 = arith.constant 0 : index
    %c0_20 = arith.constant 0 : index
    %32 = vector.load %arg8[%c0_19, %c0_20] : memref<8x8xf32, #tpu.memory_space<vmem>>, vector<8x8xf32>
    tpu.vector_store %arg8[%c0_19, %c0_20], %31 {strides = array<i32>} : memref<8x8xf32, #tpu.memory_space<vmem>>, vector<8x8xf32>,
    return
  }
  func.func @transform_0(%arg0: i32) -> (i32, i32) {
    %c0_i32 = arith.constant 0 : i32
    %c0_i32_0 = arith.constant 0 : i32
    return %arg0, %c0_i32 : i32, i32
  }
  func.func @transform_1(%arg0: i32) -> (i32, i32) {
    %c0_i32 = arith.constant 0 : i32
    %c0_i32_0 = arith.constant 0 : i32
    %c0_i32_1 = arith.constant 0 : i32
    return %c0_i32, %c0_i32_0 : i32, i32
  }
  func.func @transform_2(%arg0: i32) -> (i32, i32) {
    %c0_i32 = arith.constant 0 : i32
    %c0_i32_0 = arith.constant 0 : i32
    %c0_i32_1 = arith.constant 0 : i32
    return %c0_i32, %c0_i32_0 : i32, i32
  }
  func.func @transform_3(%arg0: i32) -> (i32, i32) {
    %c0_i32 = arith.constant 0 : i32
    %c0_i32_0 = arith.constant 0 : i32
    %c0_i32_1 = arith.constant 0 : i32
    return %c0_i32, %c0_i32_0 : i32, i32
  }
  func.func @transform_4(%arg0: i32) -> (i32, i32) {
    %c0_i32 = arith.constant 0 : i32
    %c0_i32_0 = arith.constant 0 : i32
    %c0_i32_1 = arith.constant 0 : i32
    return %c0_i32, %c0_i32_0 : i32, i32
  }
  func.func @transform_5(%arg0: i32) -> (i32, i32) {
    %c0_i32 = arith.constant 0 : i32
    %c0_i32_0 = arith.constant 0 : i32
    %c0_i32_1 = arith.constant 0 : i32
    return %c0_i32, %c0_i32_0 : i32, i32
  }
  func.func @transform_6(%arg0: i32) -> (i32, i32) {
    %c0_i32 = arith.constant 0 : i32
    %c0_i32_0 = arith.constant 0 : i32
    %c0_i32_1 = arith.constant 0 : i32
    return %c0_i32, %c0_i32_0 : i32, i32
  }
  func.func @transform_7(%arg0: i32) -> (i32, i32) {
    %c0_i32 = arith.constant 0 : i32
    %c0_i32_0 = arith.constant 0 : i32
    return %arg0, %c0_i32 : i32, i32
  }
}

</mosaic_0001>

<bundles_post_ra>
// kernel: tpu_custom_call.1
= control target key start
LH: loop header
LB: loop body
LE: loop exit
PB: predicated region body
PF: predicated region fallthrough
CT: control target
= control target key end

     0   :  { %12 = vsyncpa [#allocation3], 0  ;;  %v432_v1 = vmov 0.0   ;;  %vm45_vm0 = vcmask 130048   ;;  %vm433_vm1 = vmmov 0   ;;  %vm243_vm2 = vcmask 523264   ;;  %s534_s0 = inlined_call_operand.vmem [shape: f32[2,16], index: 0, kind: input, shape index: {}]   ;;  %s535_s1 = inlined_call_operand.vmem [shape: bf16[16,128], index: 1, kind: input, shape index: {}]   ;;  %s536_s2 = inlined_call_operand.vmem [shape: f32[1,128], index: 2, kind: input, shape index: {}]   ;;  %s537_s3 = inlined_call_operand.vmem [shape: bf16[128,64], index: 3, kind: input, shape index: {}]   ;;  %s538_s4 = inlined_call_operand.vmem [shape: f32[1,64], index: 4, kind: input, shape index: {}]   ;;  %s539_s5 = inlined_call_operand.vmem [shape: bf16[64,8], index: 5, kind: input, shape index: {}]   ;;  %s540_s6 = inlined_call_operand.vmem [shape: f32[1,8], index: 6, kind: input, shape index: {}]   ;;  %s541_s7 = inlined_call_operand.hbm [shape: f32[2,8], index: 7, kind: output, shape index: {}]  }
   0x1   :  { %v393_v0 = vld [vmem:[%s535_s1] sm:$0xff]   ;;  %350 = vmatprep.subr.bf16.mxu0 %v432_v1  ;;  %356 = vmatprep.subr.bf16.mxu1 %v432_v1  ;;  %v394_v3 = vld [vmem:[%s537_s3 + $0x38] sm:$0xff]   ;;  %v395_v5 = vld [vmem:[%s537_s3 + $0x30] sm:$0xff]   ;;  %vm287_vm3 = vcmask 64512  }
   0x2   :  { %v28_v2 = vld [vmem:[%s534_s0] sm:$0xff]  ;;  %351 = vmatpush3.bf16.msra.mxu0 %v393_v0  ;;  %352 = vmatprep.mubr.msk.bf16.mxu0 %vm433_vm1, %v432_v1  ;;  %v396_v6 = vld [vmem:[%s537_s3 + $0x28] sm:$0xff]   ;;  %v398_v8 = vld [vmem:[%s537_s3 + $0x18] sm:$0xff]  }
   0x3   :  { %v29_v4 = vpack.c.bf16 %v28_v2, %v28_v2  ;;  %357 = vmatpush3.bf16.msra.mxu1 %v394_v3  ;;  %372 = vmatprep.mubr.msk.bf16.mxu1 %vm433_vm1, %v432_v1  ;;  %v397_v7 = vld [vmem:[%s537_s3 + $0x20] sm:$0xff]   ;;  %v399_v9 = vld [vmem:[%s537_s3 + $0x10] sm:$0xff]   ;;  %v400_v10 = vld [vmem:[%s537_s3 + $0x8] sm:$0xff]  }
   0x4   :  { %358 = vmatprep.subr.bf16.mxu1 %v432_v1  ;;  %376 = vmatprep.subr.bf16.mxu0 %v432_v1  ;;  %v401_v11 = vld [vmem:[%s537_s3] sm:$0xff]   ;;  %v402_v12 = vld [vmem:[%s539_s5 + $0x18] sm:$0xff]   ;;  %v403_v13 = vld [vmem:[%s539_s5 + $0x10] sm:$0xff]  }
   0x5   :  { %353 = vmatmul.mubr.msk.bf16.vlgmr.msra.gmra.mxu0 %vm45_vm0, %v29_v4  ;;  %v316_v14 = vld [vmem:[%s536_s2] ss:$0 sm:$0xff]  ;;  %v404_v22 = vld [vmem:[%s539_s5 + $0x8] sm:$0xff]  }
   0x6   :  { %384 = vmatprep.mubr.msk.bf16.mxu0 %vm433_vm1, %v432_v1  ;;  %377 = vmatpush3.bf16.msra.mxu0 %v402_v12  ;;  %v405_v23 = vld [vmem:[%s539_s5] sm:$0xff]  }
   0x7   :  { %359 = vmatpush3.bf16.msra.mxu1 %v395_v5  ;;  %378 = vmatprep.subr.bf16.mxu0 %v432_v1  ;;  %v319_v24 = vld [vmem:[%s538_s4] ss:$0 sm:$0xff] }
   0x8   :  { %360 = vmatprep.subr.bf16.mxu1 %v432_v1  ;;  %v328_v32 = vld [vmem:[%s540_s6] ss:$0 sm:$0xff] }
   0xa   :  { %379 = vmatpush3.bf16.msra.mxu0 %v403_v13 }
   0xb   :  { %361 = vmatpush3.bf16.msra.mxu1 %v396_v6  ;;  %380 = vmatprep.subr.bf16.mxu0 %v432_v1 }
   0xc   :  { %362 = vmatprep.subr.bf16.mxu1 %v432_v1 }
   0xe   :  { %381 = vmatpush3.bf16.msra.mxu0 %v404_v22 }
   0xf   :  { %363 = vmatpush3.bf16.msra.mxu1 %v397_v7  ;;  %382 = vmatprep.subr.bf16.mxu0 %v432_v1 }
  0x10   :  { %364 = vmatprep.subr.bf16.mxu1 %v432_v1 }
  0x12   :  { %383 = vmatpush3.bf16.msra.mxu0 %v405_v23 }
  0x13   :  { %365 = vmatpush3.bf16.msra.mxu1 %v398_v8 }
  0x14   :  { %366 = vmatprep.subr.bf16.mxu1 %v432_v1 }
  0x17   :  { %367 = vmatpush3.bf16.msra.mxu1 %v399_v9 }
  0x18   :  { %368 = vmatprep.subr.bf16.mxu1 %v432_v1 }
  0x1b   :  { %369 = vmatpush3.bf16.msra.mxu1 %v400_v10 }
  0x1c   :  { %370 = vmatprep.subr.bf16.mxu1 %v432_v1 }
  0x1f   :  { %371 = vmatpush3.bf16.msra.mxu1 %v401_v11 }
  0xc5   :  { %v83_v15 = vpop.f32.mrf.mxu0 }
  0xc6   :  { %v84_v16 = vadd.f32 %v316_v14, %v83_v15 }
  0xc7   :  { %v354_v17 = vpop.f32.mrf.mxu0 }
  0xc8   :  { %v89_v18 = vmax.f32 %v84_v16, 0.0 }
  0xc9   :  { %v86_v19 = vpop.f32.mrf.mxu0 }
  0xca   :  { %v90_v20 = vpack.c.bf16 %v89_v18, %v89_v18 }
  0xcb   :  { %v355_v21 = vpop.f32.mrf.mxu0 }
  0xcc   :  { %373 = vmatmul.mubr.bf16.vlgmr.msra.gmra.mxu1 %v90_v20 }
 0x18c   :  { %v196_v25 = vpop.f32.mrf.mxu1 }
 0x18d   :  { %v197_v26 = vadd.f32 %v319_v24, %v196_v25 }
 0x18e   :  { %v374_v27 = vpop.f32.mrf.mxu1 }
 0x18f   :  { %v202_v28 = vmax.f32 %v197_v26, 0.0 }
 0x190   :  { %v199_v29 = vpop.f32.mrf.mxu1 }
 0x191   :  { %v203_v30 = vpack.c.bf16 %v202_v28, %v202_v28 }
 0x192   :  { %v375_v31 = vpop.f32.mrf.mxu1 }
 0x193   :  { %385 = vmatmul.mubr.msk.bf16.vlgmr.msra.gmra.mxu0 %vm243_vm2, %v203_v30 }
 0x253   :  { %v281_v33 = vpop.f32.mrf.mxu0 }
 0x254   :  { %v282_v34 = vadd.f32 %v328_v32, %v281_v33 }
 0x255   :  { %v386_v35 = vpop.f32.mrf.mxu0 }
 0x256   :  { %v288_v36 = vsel %vm287_vm3, %v282_v34, -inf }
 0x257   :  { %289 = vmax.xlane.f32.xlu0 %v288_v36  ;;  %v284_v37 = vpop.f32.mrf.mxu0 }
 0x259   :  { %v387_v38 = vpop.f32.mrf.mxu0 }
 0x2e0   :  { %v290_v39 = vpop.xlane.xlu0 %289 }
 0x2e1   :  { %v291_v40 = vsub.f32 %v282_v34, %v290_v39 }
 0x2e3   :  { %v292_v41 = vmul.f32 1.442695, %v291_v40 }
 0x2e5   :  { %406 = vpow2.f32 %v292_v41 }
 0x2f2   :  { %v407_v42 = vpop.eup %406 }
 0x2f3   :  { %v294_v43 = vsel %vm287_vm3, %v407_v42, 0.0 }
 0x2f4   :  { %295 = vadd.xlane.f32.xlu0 %v294_v43 }
 0x37d   :  { %v296_v44 = vpop.xlane.xlu0 %295 }
 0x37e   :  { %408 = vrcp.f32 %v296_v44 }
 0x38b   :  { %v409_v45 = vpop.eup %408 }
 0x38c   :  { %v298_v46 = vmul.f32 %v409_v45, %v407_v42 }
 0x38e   :  { %299 = vst.msk [vmem:[#allocation2] sm:$0xff] %vm287_vm3, %v298_v46 }
 0x38f   :  { %304 = vsyncadd [#allocation3], 96  ;;  %s434_s4 = smov [#allocation2]  }
 0x390   :  { %s305_s5 = sshll.u32 %s434_s4, 4  ;;  %s306_s5 = int_to_ptr.vmem [resolvable:$true] %s305_s5 }
 0x391   :  { %s410_s6 = scalar_lea.vmem %s306_s5, 32  ;;  %s414_s8 = scalar_lea.vmem %s306_s5, 128 }
 0x392   :  { %p411_p0 = scmp.ne.s32.totalorder %s306_s5, %s410_s6  ;;  %p415_p1 = scmp.lt.s32.totalorder %s306_s5, %s306_s5 }
 0x393   :  { %p416_p2 = scmp.lt.s32.totalorder %s414_s8, %s410_s6 }
 0x395   :  { %p417_p3 = por %p416_p2, %p415_p1 }
 0x397   :  { %p418_p4 = pnand %p417_p3, %p411_p0 }
 0x399   :  { %421 = shalt.err (!%p418_p4)
}
 0x39a   :  { %s435_s0 = smov 32   ;;  %s436_s1 = smov 2  }
 0x39b   :  { %311 = dma.vmem_to_hbm [thread:$0]  %s306_s5, 32, %s541_s7, [#allocation3], %s435_s0, %s435_s0, %s436_s1  }
 0x39c   :  { %430 = dma.done.wait [#allocation3], 128  }
 0x39d   :  { %431 = vsyncadd [#allocation3], 4294967168 }
 0x39e   :  { %315 = vsyncpa [#allocation3], 1 }

</bundles_post_ra>
